<compile_context>
chip_gen: v6e
topology: v6e:2x2x1
jax: 0.10.0
libtpu: 0.0.40
codegen_flags: <defaults>
</compile_context>

<pallas_src>
import functools

import jax
import jax.numpy as jnp
from jax.experimental import pallas as pl
from jax.experimental.pallas import tpu as pltpu


def _round_up(v, m):
    return ((v + m - 1) // m) * m


# ----------------------------- Pallas kernel ------------------------------ #
def _conjugate_kernel(p_ref, wc_ref, ab_ref, out_ref):
    """One M-tile of ConjugateLayer.

    p_ref  : (tm, Kp)   bf16  im2col patches [real | imag], zero padded
    wc_ref : (Kp, 2Fp)  bf16  stacked complex weight [[wa, wb], [-wb, wa]]
    ab_ref : (tm, 2Fp)  f32   centre-cropped input [a | b], zero padded
    out_ref: (tm, 2Fp)  f32   [out_real | out_imag]
    """
    fp = out_ref.shape[1] // 2
    # Single fused MXU matmul -> both conv components at once (f32 accum).
    conv = jnp.dot(p_ref[...], wc_ref[...], preferred_element_type=jnp.float32)
    c = conv[:, :fp]          # conv_real = A(real) - B(imag)
    d = conv[:, fp:]          # conv_imag = B(real) + A(imag)
    ab = ab_ref[...]
    a = ab[:, :fp]
    b = ab[:, fp:]
    # Conjugate multiply epilogue in f32 (VPU); 128-aligned lane-dense stores.
    out_ref[:, :fp] = (a * c + b * d).astype(out_ref.dtype)
    out_ref[:, fp:] = (b * c - a * d).astype(out_ref.dtype)


# ------------------------------ JAX wrapper -------------------------------- #
def _im2col(x, kern_size, stride):
    """x: [N, C, H, W] -> patches [N*Ho*Wo, C*kh*kw] (C-major, then kh, kw)."""
    N, C, H, W = x.shape
    kh = kw = kern_size
    sh, sw = stride
    Ho = (H - kh) // sh + 1
    Wo = (W - kw) // sw + 1
    cols = []
    for i in range(kh):
        for j in range(kw):
            cols.append(x[:, :, i:i + sh * Ho:sh, j:j + sw * Wo:sw])
    p = jnp.stack(cols, axis=2).reshape(N, C * kh * kw, Ho, Wo)
    p = p.transpose(0, 2, 3, 1).reshape(N * Ho * Wo, C * kh * kw)
    return p, Ho, Wo


@functools.partial(jax.jit, static_argnames=("kern_size", "stride", "tm"))
def conjugate_layer(x, w_a, w_b, *, kern_size, stride=(1, 1), tm=256):
    """ConjugateLayer.forward.

    x   : [N, 2, C, H, W]   (float32)
    w_a : [F, C, kh, kw]    ComplexConv A weights (torch layout), F == C
    w_b : [F, C, kh, kw]    ComplexConv B weights
    returns [N, 2, C, Ho, Wo]
    """
    N, CC, C, H, W = x.shape
    assert CC == 2
    F = w_a.shape[0]
    assert F == C  # use_one_filter=False path
    K = C * kern_size * kern_size

    real = x[:, 0]  # [N, C, H, W]
    imag = x[:, 1]

    # im2col both components -> (M, K).
    # TODO(synk): for large real-world shapes gather patches in-kernel from
    # the raw [N,C,H,W] input instead of materialising the 9x patch matrix.
    pr, Ho, Wo = _im2col(real, kern_size, stride)
    pi, _, _ = _im2col(imag, kern_size, stride)
    M = pr.shape[0]

    # Aligned / padded sizes.
    Fp = _round_up(F, 128)        # lane-dense output halves
    Kp = _round_up(2 * K, 128)    # aligned contraction dim
    Mp = _round_up(M, tm)         # pad rows instead of divisibility assert
    Fo2 = 2 * Fp

    # Stacked patches [real | imag] -> single fused matmul operand (bf16).
    p_cat = jnp.concatenate([pr, pi], axis=1).astype(jnp.bfloat16)
    p_pad = jnp.zeros((Mp, Kp), jnp.bfloat16).at[:M, :2 * K].set(p_cat)

    # Stacked complex weight Wc = [[wa, wb], [-wb, wa]] (bf16), F padded to Fp.
    wa = w_a.reshape(F, K).T
    wb = w_b.reshape(F, K).T
    wa_p = jnp.zeros((K, Fp), x.dtype).at[:, :F].set(wa)
    wb_p = jnp.zeros((K, Fp), x.dtype).at[:, :F].set(wb)
    wc = jnp.concatenate(
        [jnp.concatenate([wa_p, wb_p], axis=1),
         jnp.concatenate([-wb_p, wa_p], axis=1)], axis=0)      # (2K, 2Fp)
    wc_pad = jnp.zeros((Kp, Fo2), jnp.bfloat16).at[:2 * K, :].set(
        wc.astype(jnp.bfloat16))

    # Centre-cropped input flattened into one lane-dense stream [a | b] (f32).
    sx = (H - Ho) // 2
    sy = (W - Wo) // 2
    a = real[:, :, sx:sx + Ho, sy:sy + Wo].transpose(0, 2, 3, 1).reshape(M, C)
    b = imag[:, :, sx:sx + Ho, sy:sy + Wo].transpose(0, 2, 3, 1).reshape(M, C)
    ab = (jnp.zeros((Mp, Fo2), x.dtype)
          .at[:M, :C].set(a)
          .at[:M, Fp:Fp + C].set(b))

    grid_spec = pltpu.PrefetchScalarGridSpec(
        num_scalar_prefetch=0,
        grid=(Mp // tm,),
        in_specs=[
            pl.BlockSpec((tm, Kp), lambda m: (m, 0)),    # patch tile
            pl.BlockSpec((Kp, Fo2), lambda m: (0, 0)),   # weights (resident)
            pl.BlockSpec((tm, Fo2), lambda m: (m, 0)),   # cropped a|b tile
        ],
        out_specs=pl.BlockSpec((tm, Fo2), lambda m: (m, 0)),
    )

    out_flat = pl.pallas_call(
        _conjugate_kernel,
        out_shape=jax.ShapeDtypeStruct((Mp, Fo2), x.dtype),
        grid_spec=grid_spec,
        compiler_params=pltpu.CompilerParams(
            dimension_semantics=("parallel",),
            vmem_limit_bytes=32 * 1024 * 1024),
    )(p_pad, wc_pad, ab)

    # Unpad and restore the module's [N, 2, C, Ho, Wo] layout.
    # TODO(synk): keep NHWC output if downstream consumers allow it (saves the
    # two transpose copies below).
    out_real = out_flat[:M, :F].reshape(N, Ho, Wo, F).transpose(0, 3, 1, 2)
    out_imag = out_flat[:M, Fp:Fp + F].reshape(N, Ho, Wo, F).transpose(0, 3, 1, 2)
    return jnp.stack([out_real, out_imag], axis=1)


# ----------------------------- reference (JAX) ----------------------------- #
def _ref_conv2d(x, w, stride=(1, 1)):
    return jax.lax.conv_general_dilated(
        x, w, window_strides=stride, padding="VALID",
        dimension_numbers=("NCHW", "OIHW", "NCHW"),
        precision=jax.lax.Precision.HIGHEST)


def _ref_conjugate_layer(x, w_a, w_b, stride=(1, 1)):
    real, imag = x[:, 0], x[:, 1]
    cr = _ref_conv2d(real, w_a, stride) - _ref_conv2d(imag, w_b, stride)
    ci = _ref_conv2d(real, w_b, stride) + _ref_conv2d(imag, w_a, stride)
    _, _, _, H, W = x.shape
    Ho, Wo = cr.shape[-2:]
    sx = (H - Ho) // 2
    sy = (W - Wo) // 2
    a = real[:, :, sx:sx + Ho, sy:sy + Wo]
    b = imag[:, :, sx:sx + Ho, sy:sy + Wo]
    out_real = a * cr + b * ci
    out_imag = b * cr - a * ci
    return jnp.stack([out_real, out_imag], axis=1)


# --------------------------------- main ------------------------------------ #
if __name__ == "__main__":
    # Small, module-consistent shapes (ConjugateLayer => num_filters == C).
    N, C, H, W = 2, 4, 16, 16
    KS = 3

    key = jax.random.PRNGKey(0)
    kx, ka, kb = jax.random.split(key, 3)

    x = jax.random.normal(kx, (N, 2, C, H, W), dtype=jnp.float32)

    # Deterministic weights mimicking ComplexConv's "new_init" (fan = C).
    std = (1.0 / jnp.sqrt(2.0)) / jnp.sqrt(KS * KS * C)
    w_a = std * jax.random.normal(ka, (C, C, KS, KS), dtype=jnp.float32)
    w_b = std * jax.random.normal(kb, (C, C, KS, KS), dtype=jnp.float32)
    # TODO(synk): reflect padding / groups>1 / dilation>1 / use_one_filter
    # (repeat) paths not implemented (module defaults exercised only).

    out = conjugate_layer(x, w_a, w_b, kern_size=KS, stride=(1, 1))
    out = jax.block_until_ready(out)

    ref = _ref_conjugate_layer(x, w_a, w_b)
    assert out.shape == ref.shape == (N, 2, C, H - KS + 1, W - KS + 1)
    # bf16 matmul operands => compare with a relative-norm check.
    rel_err = jnp.linalg.norm((out - ref).ravel()) / jnp.linalg.norm(ref.ravel())
    assert float(rel_err) < 1e-2, f"rel_err={float(rel_err)}"

    print("KERNEL_OK")
</pallas_src>

<mosaic_0001>
module attributes {stable_mosaic.version = 11 : i64} {
  func.func @_conjugate_kernel(%arg0: i32, %arg1: memref<256x128xbf16, #tpu.memory_space<vmem>>, %arg2: memref<128x256xbf16, #tpu.memory_space<vmem>>, %arg3: memref<256x256xf32, #tpu.memory_space<vmem>>, %arg4: memref<256x256xf32, #tpu.memory_space<vmem>>) attributes {dimension_semantics = [#tpu.dimension_semantics<parallel>], iteration_bounds = array<i64: 2>, scalar_prefetch = 0 : i64, scratch_operands = 0 : i64, tpu.core_type = #tpu.core_type<tc>, window_params = [{transform_indices = @transform_0, window_bounds = array<i64: 256, 128>}, {pipeline_mode = #tpu.pipeline_mode<synchronous>, transform_indices = @transform_1, window_bounds = array<i64: 128, 256>}, {transform_indices = @transform_2, window_bounds = array<i64: 256, 256>}, {transform_indices = @transform_3, window_bounds = array<i64: 256, 256>}]} {
    %c0 = arith.constant 0 : index
    %c0_0 = arith.constant 0 : index
    %0 = vector.load %arg1[%c0, %c0_0] : memref<256x128xbf16, #tpu.memory_space<vmem>>, vector<256x128xbf16>
    %c0_1 = arith.constant 0 : index
    %c0_2 = arith.constant 0 : index
    %1 = vector.load %arg2[%c0_1, %c0_2] : memref<128x256xbf16, #tpu.memory_space<vmem>>, vector<128x256xbf16>
    %cst = arith.constant dense<0.000000e+00> : vector<256x256xf32>
    %2 = tpu.matmul %0, %1, %cst {dimension_numbers = #tpu.dot_dimension_numbers<[1], [0], [0], [1], [0, 0, 1, 1], [], []>} : vector<256x128xbf16>, vector<128x256xbf16>, vector<256x256xf32> -> vector<256x256xf32>
    %3 = vector.extract_strided_slice %2 {offsets = [0, 0], sizes = [256, 128], strides = [1, 1]} : vector<256x256xf32> to vector<256x128xf32>
    %4 = vector.extract_strided_slice %2 {offsets = [0, 128], sizes = [256, 128], strides = [1, 1]} : vector<256x256xf32> to vector<256x128xf32>
    %c0_3 = arith.constant 0 : index
    %c0_4 = arith.constant 0 : index
    %5 = vector.load %arg3[%c0_3, %c0_4] : memref<256x256xf32, #tpu.memory_space<vmem>>, vector<256x256xf32>
    %6 = vector.extract_strided_slice %5 {offsets = [0, 0], sizes = [256, 128], strides = [1, 1]} : vector<256x256xf32> to vector<256x128xf32>
    %7 = vector.extract_strided_slice %5 {offsets = [0, 128], sizes = [256, 128], strides = [1, 1]} : vector<256x256xf32> to vector<256x128xf32>
    %8 = arith.mulf %6, %3 : vector<256x128xf32>
    %9 = arith.mulf %7, %4 : vector<256x128xf32>
    %10 = arith.addf %8, %9 : vector<256x128xf32>
    %c0_5 = arith.constant 0 : index
    %c0_6 = arith.constant 0 : index
    %11 = vector.load %arg4[%c0_5, %c0_6] : memref<256x256xf32, #tpu.memory_space<vmem>>, vector<256x128xf32>
    tpu.vector_store %arg4[%c0_5, %c0_6], %10 {strides = array<i32>} : memref<256x256xf32, #tpu.memory_space<vmem>>, vector<256x128xf32>,
    %12 = arith.mulf %7, %3 : vector<256x128xf32>
    %13 = arith.mulf %6, %4 : vector<256x128xf32>
    %14 = arith.subf %12, %13 : vector<256x128xf32>
    %c0_7 = arith.constant 0 : index
    %c128 = arith.constant 128 : index
    %15 = vector.load %arg4[%c0_7, %c128] : memref<256x256xf32, #tpu.memory_space<vmem>>, vector<256x128xf32>
    tpu.vector_store %arg4[%c0_7, %c128], %14 {strides = array<i32>} : memref<256x256xf32, #tpu.memory_space<vmem>>, vector<256x128xf32>,
    return
  }
  func.func @transform_0(%arg0: i32) -> (i32, i32) {
    %c0_i32 = arith.constant 0 : i32
    %c0_i32_0 = arith.constant 0 : i32
    return %arg0, %c0_i32 : i32, i32
  }
  func.func @transform_1(%arg0: i32) -> (i32, i32) {
    %c0_i32 = arith.constant 0 : i32
    %c0_i32_0 = arith.constant 0 : i32
    %c0_i32_1 = arith.constant 0 : i32
    return %c0_i32, %c0_i32_0 : i32, i32
  }
  func.func @transform_2(%arg0: i32) -> (i32, i32) {
    %c0_i32 = arith.constant 0 : i32
    %c0_i32_0 = arith.constant 0 : i32
    return %arg0, %c0_i32 : i32, i32
  }
  func.func @transform_3(%arg0: i32) -> (i32, i32) {
    %c0_i32 = arith.constant 0 : i32
    %c0_i32_0 = arith.constant 0 : i32
    return %arg0, %c0_i32 : i32, i32
  }
}

</mosaic_0001>

<bundles_post_ra>
// kernel: conjugate_layer.1
= control target key start
LH: loop header
LB: loop body
LE: loop exit
PB: predicated region body
PF: predicated region fallthrough
CT: control target
= control target key end

     0   :  { %s1152_s12 = smov 0   ;;  %s1390_s0 = inlined_call_operand.vmem [shape: bf16[512,128], index: 0, kind: input, shape index: {}]   ;;  %s1391_s1 = inlined_call_operand.vmem [shape: bf16[128,256], index: 1, kind: input, shape index: {}]   ;;  %s1392_s2 = inlined_call_operand.vmem [shape: f32[512,256], index: 2, kind: input, shape index: {}]   ;;  %s1393_s3 = inlined_call_operand.vmem [shape: f32[512,256], index: 3, kind: output, shape index: {}]  }
   0x1 LB: > { %s1009_s13 = sadd.s32 4294967295, %s1129_s12   ;;  %p1013_p0 = scmp.ge.s32.totalorder %s1129_s12, 1  ;;  %s1129_s12 = sphi %s1152_s12, %s13_s12  }
   0x2   : > { %p150_p1 = scmp.lt.s32.totalorder %s1129_s12, 3 }
   0x4   : > { %p151_p2 = pnand %p1013_p0, %p150_p1 }
   0x5   : > { %s1014_s16 = sshll.u32 (!%p151_p2), %s1009_s13, 5 }
   0x6   : > { %154 = sbr.rel (%p151_p2) target bundleno = 306 (0x132), region = 32  ;;  %p182_p3 = scmp.lt.s32.totalorder (!%p151_p2), %s1014_s16, 63 }
   0xb   : > { %v1083_v0 = vld [vmem:[%s1391_s1 + $0x74] ss:$8 sps:$4 sm:$0xff]   ;;  %v1085_v1 = vld [vmem:[%s1391_s1 + $0x70] ss:$8 sps:$4 sm:$0xff]   ;;  %v1131_v2 = vmov 0   ;;  %s1395_s16 = smov (!%p182_p3, %s1014_s16), 63 }
   0xc   : > { %458 = vmatprep.mubr.bf16.mxu0 %v1131_v2  ;;  %538 = vmatprep.mubr.bf16.mxu1 %v1131_v2  ;;  %v1086_v3 = vld [vmem:[%s1391_s1 + $0x64] ss:$8 sps:$4 sm:$0xff]   ;;  %v1088_v4 = vld [vmem:[%s1391_s1 + $0x60] ss:$8 sps:$4 sm:$0xff]   ;;  %v1089_v5 = vld [vmem:[%s1391_s1 + $0x54] ss:$8 sps:$4 sm:$0xff]  }
   0xd   : > { %426 = vmatprep.subr.bf16.mxu0 %v1083_v0  ;;  %1058 = vmatprep.subr.bf16.mxu1 %v1083_v0  ;;  %s1015_s25 = sshll.u32 %s1395_s16, 2  ;;  %v1091_v6 = vld [vmem:[%s1391_s1 + $0x50] ss:$8 sps:$4 sm:$0xff]   ;;  %v1092_v7 = vld [vmem:[%s1391_s1 + $0x44] ss:$8 sps:$4 sm:$0xff]   ;;  %s1056_s26 = sshll.u32 %s1395_s16, 4 }
   0xe   : > { %427 = vmatpush1.bf16.msra.mxu0 %v1085_v1  ;;  %1066 = vmatpush1.bf16.msra.mxu1 %v1085_v1  ;;  %s1189_s5 = scalar_lea.vmem %s1390_s0, %s1015_s25  ;;  %v1094_v8 = vld [vmem:[%s1391_s1 + $0x40] ss:$8 sps:$4 sm:$0xff]   ;;  %v1095_v9 = vld [vmem:[%s1391_s1 + $0x34] ss:$8 sps:$4 sm:$0xff]   ;;  %v1097_v10 = vld [vmem:[%s1391_s1 + $0x30] ss:$8 sps:$4 sm:$0xff]   ;;  %s1252_s29 = scalar_lea.vmem %s1392_s2, %s1056_s26 }
   0xf   : > { %428 = vmatprep.subr.bf16.mxu0 %v1086_v3  ;;  %1059 = vmatprep.subr.bf16.mxu1 %v1086_v3  ;;  %v1098_v11 = vld [vmem:[%s1391_s1 + $0x24] ss:$8 sps:$4 sm:$0xff]   ;;  %v1100_v12 = vld [vmem:[%s1391_s1 + $0x20] ss:$8 sps:$4 sm:$0xff]   ;;  %v1101_v13 = vld [vmem:[%s1391_s1 + $0x14] ss:$8 sps:$4 sm:$0xff]   ;;  %s1265_s4 = scalar_lea.vmem %s1393_s3, %s1056_s26 }
  0x10   : > { %v1103_v14 = vld [vmem:[%s1391_s1 + $0x10] ss:$8 sps:$4 sm:$0xff]   ;;  %v1104_v15 = vld [vmem:[%s1391_s1 + $0x4] ss:$8 sps:$4 sm:$0xff]   ;;  %v1106_v16 = vld [vmem:[%s1391_s1] ss:$8 sps:$4 sm:$0xff]  }
  0x11   : > { %v1107_v17 = vld [vmem:[%s1189_s5] sm:$0xff]   ;;  %v1109_v19 = vld [vmem:[%s1189_s5 + $0x8] sm:$0xff]   ;;  %v1111_v21 = vld [vmem:[%s1189_s5 + $0x10] sm:$0xff]  }
  0x12   : > { %429 = vmatpush1.bf16.msra.mxu0 %v1088_v4  ;;  %1067 = vmatpush1.bf16.msra.mxu1 %v1088_v4  ;;  %v1108_v18 = vld [vmem:[%s1189_s5 + $0x40] sm:$0xff]   ;;  %v1110_v20 = vld [vmem:[%s1189_s5 + $0x48] sm:$0xff]   ;;  %v1112_v22 = vld [vmem:[%s1189_s5 + $0x50] sm:$0xff]  }
  0x13   : > { %430 = vmatprep.subr.bf16.mxu0 %v1089_v5  ;;  %1060 = vmatprep.subr.bf16.mxu1 %v1089_v5  ;;  %v1113_v23 = vld [vmem:[%s1189_s5 + $0x18] sm:$0xff]   ;;  %v1115_v25 = vld [vmem:[%s1189_s5 + $0x20] sm:$0xff]   ;;  %v1117_v27 = vld [vmem:[%s1189_s5 + $0x28] sm:$0xff]  }
  0x14   : > { %v1114_v24 = vld [vmem:[%s1189_s5 + $0x58] sm:$0xff]   ;;  %v1116_v26 = vld [vmem:[%s1189_s5 + $0x60] sm:$0xff]   ;;  %v1118_v28 = vld [vmem:[%s1189_s5 + $0x68] sm:$0xff]  }
  0x15   : > { %v1119_v29 = vld [vmem:[%s1189_s5 + $0x30] sm:$0xff]   ;;  %v1121_v31 = vld [vmem:[%s1189_s5 + $0x38] sm:$0xff]   ;;  %v619_v33 = vld [vmem:[%s1252_s29] sm:$0xff] }
  0x16   : > { %431 = vmatpush1.bf16.msra.mxu0 %v1091_v6  ;;  %1068 = vmatpush1.bf16.msra.mxu1 %v1091_v6  ;;  %v1120_v30 = vld [vmem:[%s1189_s5 + $0x70] sm:$0xff]   ;;  %v1122_v32 = vld [vmem:[%s1189_s5 + $0x78] sm:$0xff]   ;;  %v620_v34 = vld [vmem:[%s1252_s29 + $0x8] sm:$0xff] }
  0x17   : > { %432 = vmatprep.subr.bf16.mxu0 %v1092_v7  ;;  %1061 = vmatprep.subr.bf16.mxu1 %v1092_v7  ;;  %v651_v35 = vld [vmem:[%s1252_s29 + $0x100] sm:$0xff]  ;;  %v652_v36 = vld [vmem:[%s1252_s29 + $0x108] sm:$0xff]  ;;  %v621_v45 = vld [vmem:[%s1252_s29 + $0x10] sm:$0xff] }
  0x18   : > { %v622_v50 = vld [vmem:[%s1252_s29 + $0x18] sm:$0xff]  ;;  %v653_v51 = vld [vmem:[%s1252_s29 + $0x110] sm:$0xff]  ;;  %v623_v1 = vld [vmem:[%s1252_s29 + $0x20] sm:$0xff] }
  0x19   : > { %v654_v52 = vld [vmem:[%s1252_s29 + $0x118] sm:$0xff]  ;;  %v624_v6 = vld [vmem:[%s1252_s29 + $0x28] sm:$0xff]  ;;  %v655_v7 = vld [vmem:[%s1252_s29 + $0x120] sm:$0xff] }
  0x1a   : > { %433 = vmatpush1.bf16.msra.mxu0 %v1094_v8  ;;  %1069 = vmatpush1.bf16.msra.mxu1 %v1094_v8  ;;  %v656_v8 = vld [vmem:[%s1252_s29 + $0x128] sm:$0xff] }
  0x1b   : > { %434 = vmatprep.subr.bf16.mxu0 %v1095_v9  ;;  %1062 = vmatprep.subr.bf16.mxu1 %v1095_v9 }
  0x1e   : > { %435 = vmatpush1.bf16.msra.mxu0 %v1097_v10  ;;  %1070 = vmatpush1.bf16.msra.mxu1 %v1097_v10 }
  0x1f   : > { %436 = vmatprep.subr.bf16.mxu0 %v1098_v11  ;;  %1063 = vmatprep.subr.bf16.mxu1 %v1098_v11 }
  0x22   : > { %437 = vmatpush1.bf16.msra.mxu0 %v1100_v12  ;;  %1071 = vmatpush1.bf16.msra.mxu1 %v1100_v12 }
  0x23   : > { %438 = vmatprep.subr.bf16.mxu0 %v1101_v13  ;;  %1064 = vmatprep.subr.bf16.mxu1 %v1101_v13 }
  0x26   : > { %439 = vmatpush1.bf16.msra.mxu0 %v1103_v14  ;;  %1072 = vmatpush1.bf16.msra.mxu1 %v1103_v14 }
  0x27   : > { %440 = vmatprep.subr.bf16.mxu0 %v1104_v15  ;;  %1065 = vmatprep.subr.bf16.mxu1 %v1104_v15 }
  0x2a   : > { %441 = vmatpush1.bf16.msra.mxu0 %v1106_v16  ;;  %1073 = vmatpush1.bf16.msra.mxu1 %v1106_v16 }
  0x2d   : > { %459 = vmatmul.mubr.bf16.vlgmr.msra.gmra.mxu0 %v1107_v17  ;;  %539 = vmatmul.mubr.bf16.vlgmr.msra.gmra.mxu1 %v1108_v18 }
  0x2e   : > { %468 = vmatprep.mubr.bf16.mxu0 %v1131_v2  ;;  %548 = vmatprep.mubr.bf16.mxu1 %v1131_v2 }
  0x35   : > { %469 = vmatmul.mubr.bf16.gmra.mxu0 %v1109_v19  ;;  %549 = vmatmul.mubr.bf16.gmra.mxu1 %v1110_v20 }
  0x36   : > { %478 = vmatprep.mubr.bf16.mxu0 %v1131_v2  ;;  %558 = vmatprep.mubr.bf16.mxu1 %v1131_v2 }
  0x3d   : > { %479 = vmatmul.mubr.bf16.gmra.mxu0 %v1111_v21  ;;  %559 = vmatmul.mubr.bf16.gmra.mxu1 %v1112_v22  ;;  %v625_v21 = vld [vmem:[%s1252_s29 + $0x30] sm:$0xff] }
  0x3e   : > { %488 = vmatprep.mubr.bf16.mxu0 %v1131_v2  ;;  %568 = vmatprep.mubr.bf16.mxu1 %v1131_v2 }
  0x45   : > { %489 = vmatmul.mubr.bf16.gmra.mxu0 %v1113_v23  ;;  %569 = vmatmul.mubr.bf16.gmra.mxu1 %v1114_v24 }
  0x46   : > { %498 = vmatprep.mubr.bf16.mxu0 %v1131_v2  ;;  %578 = vmatprep.mubr.bf16.mxu1 %v1131_v2 }
  0x4d   : > { %499 = vmatmul.mubr.bf16.gmra.mxu0 %v1115_v25  ;;  %579 = vmatmul.mubr.bf16.gmra.mxu1 %v1116_v26  ;;  %v626_v26 = vld [vmem:[%s1252_s29 + $0x38] sm:$0xff] }
  0x4e   : > { %508 = vmatprep.mubr.bf16.mxu0 %v1131_v2  ;;  %588 = vmatprep.mubr.bf16.mxu1 %v1131_v2 }
  0x55   : > { %509 = vmatmul.mubr.bf16.gmra.mxu0 %v1117_v27  ;;  %589 = vmatmul.mubr.bf16.gmra.mxu1 %v1118_v28  ;;  %v657_v27 = vld [vmem:[%s1252_s29 + $0x130] sm:$0xff]  ;;  %v658_v28 = vld [vmem:[%s1252_s29 + $0x138] sm:$0xff] }
  0x56   : > { %518 = vmatprep.mubr.bf16.mxu0 %v1131_v2  ;;  %598 = vmatprep.mubr.bf16.mxu1 %v1131_v2 }
  0x5d   : > { %519 = vmatmul.mubr.bf16.gmra.mxu0 %v1119_v29  ;;  %599 = vmatmul.mubr.bf16.gmra.mxu1 %v1120_v30 }
  0x5e   : > { %528 = vmatprep.mubr.bf16.mxu0 %v1131_v2  ;;  %608 = vmatprep.mubr.bf16.mxu1 %v1131_v2 }
  0x65   : > { %529 = vmatmul.mubr.bf16.gmra.mxu0 %v1121_v31  ;;  %609 = vmatmul.mubr.bf16.gmra.mxu1 %v1122_v32 }
  0xed   : > { %v460_v37 = vpop.f32.mrf.mxu0  ;;  %v540_v38 = vpop.f32.mrf.mxu1 }
  0xee   : > { %v683_v39 = vmul.f32 %v619_v33, %v460_v37  ;;  %v811_v40 = vmul.f32 %v620_v34, %v460_v37  ;;  %v699_v41 = vmul.f32 %v651_v35, %v540_v38  ;;  %v827_v42 = vmul.f32 %v652_v36, %v540_v38 }
  0xef   : > { %v462_v43 = vpop.f32.mrf.mxu0  ;;  %v542_v44 = vpop.f32.mrf.mxu1 }
  0xf0   : > { %v715_v46 = vmul.f32 %v620_v34, %v462_v43  ;;  %v843_v47 = vmul.f32 %v619_v33, %v462_v43  ;;  %v731_v48 = vmul.f32 %v652_v36, %v542_v44  ;;  %v859_v49 = vmul.f32 %v651_v35, %v542_v44 }
  0xf1   : > { %v464_v53 = vpop.f32.mrf.mxu0  ;;  %v544_v54 = vpop.f32.mrf.mxu1 }
  0xf2   : > { %v747_v55 = vadd.f32 %v715_v46, %v683_v39  ;;  %v875_v56 = vsub.f32 %v811_v40, %v843_v47  ;;  %v763_v57 = vadd.f32 %v731_v48, %v699_v41  ;;  %v891_v58 = vsub.f32 %v827_v42, %v859_v49  ;;  %v627_v41 = vld [vmem:[%s1252_s29 + $0x40] sm:$0xff]  ;;  %v628_v46 = vld [vmem:[%s1252_s29 + $0x48] sm:$0xff] }
  0xf3   : > { %v684_v59 = vmul.f32 %v621_v45, %v464_v53  ;;  %v812_v60 = vmul.f32 %v622_v50, %v464_v53  ;;  %v700_v61 = vmul.f32 %v653_v51, %v544_v54  ;;  %v828_v62 = vmul.f32 %v654_v52, %v544_v54  ;;  %v466_v63 = vpop.f32.mrf.mxu0  ;;  %v546_v0 = vpop.f32.mrf.mxu1  ;;  %v659_v47 = vld [vmem:[%s1252_s29 + $0x140] sm:$0xff]  ;;  %v660_v48 = vld [vmem:[%s1252_s29 + $0x148] sm:$0xff] }
  0xf4   : > { %779 = vst [vmem:[%s1265_s4] sm:$0xff] %v747_v55  ;;  %907 = vst [vmem:[%s1265_s4 + $0x8] sm:$0xff] %v875_v56  ;;  %v716_v2 = vmul.f32 %v622_v50, %v466_v63  ;;  %v844_v3 = vmul.f32 %v621_v45, %v466_v63  ;;  %v732_v4 = vmul.f32 %v654_v52, %v546_v0 }
  0xf5   : > { %795 = vst [vmem:[%s1265_s4 + $0x100] sm:$0xff] %v763_v57  ;;  %923 = vst [vmem:[%s1265_s4 + $0x108] sm:$0xff] %v891_v58  ;;  %v860_v5 = vmul.f32 %v653_v51, %v546_v0  ;;  %v470_v9 = vpop.f32.mrf.mxu0  ;;  %v550_v10 = vpop.f32.mrf.mxu1 }
  0xf6   : > { %v748_v11 = vadd.f32 %v716_v2, %v684_v59  ;;  %v876_v12 = vsub.f32 %v812_v60, %v844_v3  ;;  %v764_v13 = vadd.f32 %v732_v4, %v700_v61  ;;  %v685_v15 = vmul.f32 %v623_v1, %v470_v9  ;;  %v629_v61 = vld [vmem:[%s1252_s29 + $0x50] sm:$0xff]  ;;  %v630_v2 = vld [vmem:[%s1252_s29 + $0x58] sm:$0xff] }
  0xf7   : > { %v892_v14 = vsub.f32 %v828_v62, %v860_v5  ;;  %v813_v16 = vmul.f32 %v624_v6, %v470_v9  ;;  %v701_v17 = vmul.f32 %v655_v7, %v550_v10  ;;  %v829_v18 = vmul.f32 %v656_v8, %v550_v10  ;;  %v472_v19 = vpop.f32.mrf.mxu0  ;;  %v552_v20 = vpop.f32.mrf.mxu1  ;;  %v661_v3 = vld [vmem:[%s1252_s29 + $0x150] sm:$0xff]  ;;  %v662_v4 = vld [vmem:[%s1252_s29 + $0x158] sm:$0xff] }
  0xf8   : > { %780 = vst [vmem:[%s1265_s4 + $0x10] sm:$0xff] %v748_v11  ;;  %908 = vst [vmem:[%s1265_s4 + $0x18] sm:$0xff] %v876_v12  ;;  %v717_v22 = vmul.f32 %v624_v6, %v472_v19  ;;  %v845_v23 = vmul.f32 %v623_v1, %v472_v19  ;;  %v733_v24 = vmul.f32 %v656_v8, %v552_v20 }
  0xf9   : > { %796 = vst [vmem:[%s1265_s4 + $0x110] sm:$0xff] %v764_v13  ;;  %924 = vst [vmem:[%s1265_s4 + $0x118] sm:$0xff] %v892_v14  ;;  %v861_v25 = vmul.f32 %v655_v7, %v552_v20  ;;  %v474_v29 = vpop.f32.mrf.mxu0  ;;  %v554_v30 = vpop.f32.mrf.mxu1 }
  0xfa   : > { %v749_v31 = vadd.f32 %v717_v22, %v685_v15  ;;  %v877_v32 = vsub.f32 %v813_v16, %v845_v23  ;;  %v765_v33 = vadd.f32 %v733_v24, %v701_v17  ;;  %v686_v35 = vmul.f32 %v625_v21, %v474_v29  ;;  %v631_v17 = vld [vmem:[%s1252_s29 + $0x60] sm:$0xff]  ;;  %v632_v22 = vld [vmem:[%s1252_s29 + $0x68] sm:$0xff] }
  0xfb   : > { %v893_v34 = vsub.f32 %v829_v18, %v861_v25  ;;  %v814_v36 = vmul.f32 %v626_v26, %v474_v29  ;;  %v702_v37 = vmul.f32 %v657_v27, %v554_v30  ;;  %v830_v38 = vmul.f32 %v658_v28, %v554_v30  ;;  %v476_v39 = vpop.f32.mrf.mxu0  ;;  %v556_v40 = vpop.f32.mrf.mxu1  ;;  %v663_v23 = vld [vmem:[%s1252_s29 + $0x160] sm:$0xff]  ;;  %v664_v24 = vld [vmem:[%s1252_s29 + $0x168] sm:$0xff] }
  0xfc   : > { %781 = vst [vmem:[%s1265_s4 + $0x20] sm:$0xff] %v749_v31  ;;  %909 = vst [vmem:[%s1265_s4 + $0x28] sm:$0xff] %v877_v32  ;;  %v718_v42 = vmul.f32 %v626_v26, %v476_v39  ;;  %v846_v43 = vmul.f32 %v625_v21, %v476_v39  ;;  %v734_v44 = vmul.f32 %v658_v28, %v556_v40 }
  0xfd   : > { %797 = vst [vmem:[%s1265_s4 + $0x120] sm:$0xff] %v765_v33  ;;  %925 = vst [vmem:[%s1265_s4 + $0x128] sm:$0xff] %v893_v34  ;;  %v862_v45 = vmul.f32 %v657_v27, %v556_v40  ;;  %v480_v49 = vpop.f32.mrf.mxu0  ;;  %v560_v50 = vpop.f32.mrf.mxu1 }
  0xfe   : > { %v750_v51 = vadd.f32 %v718_v42, %v686_v35  ;;  %v878_v52 = vsub.f32 %v814_v36, %v846_v43  ;;  %v766_v53 = vadd.f32 %v734_v44, %v702_v37  ;;  %v687_v55 = vmul.f32 %v627_v41, %v480_v49  ;;  %v633_v37 = vld [vmem:[%s1252_s29 + $0x70] sm:$0xff]  ;;  %v634_v42 = vld [vmem:[%s1252_s29 + $0x78] sm:$0xff] }
  0xff   : > { %v894_v54 = vsub.f32 %v830_v38, %v862_v45  ;;  %v815_v56 = vmul.f32 %v628_v46, %v480_v49  ;;  %v703_v57 = vmul.f32 %v659_v47, %v560_v50  ;;  %v831_v58 = vmul.f32 %v660_v48, %v560_v50  ;;  %v482_v59 = vpop.f32.mrf.mxu0  ;;  %v562_v60 = vpop.f32.mrf.mxu1  ;;  %v665_v43 = vld [vmem:[%s1252_s29 + $0x170] sm:$0xff]  ;;  %v666_v44 = vld [vmem:[%s1252_s29 + $0x178] sm:$0xff] }
 0x100   : > { %782 = vst [vmem:[%s1265_s4 + $0x30] sm:$0xff] %v750_v51  ;;  %910 = vst [vmem:[%s1265_s4 + $0x38] sm:$0xff] %v878_v52  ;;  %v719_v62 = vmul.f32 %v628_v46, %v482_v59  ;;  %v847_v63 = vmul.f32 %v627_v41, %v482_v59  ;;  %v735_v0 = vmul.f32 %v660_v48, %v562_v60 }
 0x101   : > { %798 = vst [vmem:[%s1265_s4 + $0x130] sm:$0xff] %v766_v53  ;;  %926 = vst [vmem:[%s1265_s4 + $0x138] sm:$0xff] %v894_v54  ;;  %v863_v1 = vmul.f32 %v659_v47, %v562_v60  ;;  %v484_v5 = vpop.f32.mrf.mxu0  ;;  %v564_v6 = vpop.f32.mrf.mxu1 }
 0x102   : > { %v751_v7 = vadd.f32 %v719_v62, %v687_v55  ;;  %v879_v8 = vsub.f32 %v815_v56, %v847_v63  ;;  %v767_v9 = vadd.f32 %v735_v0, %v703_v57  ;;  %v688_v11 = vmul.f32 %v629_v61, %v484_v5  ;;  %v635_v57 = vld [vmem:[%s1252_s29 + $0x80] sm:$0xff]  ;;  %v636_v62 = vld [vmem:[%s1252_s29 + $0x88] sm:$0xff] }
 0x103   : > { %v895_v10 = vsub.f32 %v831_v58, %v863_v1  ;;  %v816_v12 = vmul.f32 %v630_v2, %v484_v5  ;;  %v704_v13 = vmul.f32 %v661_v3, %v564_v6  ;;  %v832_v14 = vmul.f32 %v662_v4, %v564_v6  ;;  %v486_v15 = vpop.f32.mrf.mxu0  ;;  %v566_v16 = vpop.f32.mrf.mxu1  ;;  %v667_v63 = vld [vmem:[%s1252_s29 + $0x180] sm:$0xff]  ;;  %v668_v0 = vld [vmem:[%s1252_s29 + $0x188] sm:$0xff] }
 0x104   : > { %783 = vst [vmem:[%s1265_s4 + $0x40] sm:$0xff] %v751_v7  ;;  %911 = vst [vmem:[%s1265_s4 + $0x48] sm:$0xff] %v879_v8  ;;  %v720_v18 = vmul.f32 %v630_v2, %v486_v15  ;;  %v848_v19 = vmul.f32 %v629_v61, %v486_v15  ;;  %v736_v20 = vmul.f32 %v662_v4, %v566_v16 }
 0x105   : > { %799 = vst [vmem:[%s1265_s4 + $0x140] sm:$0xff] %v767_v9  ;;  %927 = vst [vmem:[%s1265_s4 + $0x148] sm:$0xff] %v895_v10  ;;  %v864_v21 = vmul.f32 %v661_v3, %v566_v16  ;;  %v490_v25 = vpop.f32.mrf.mxu0  ;;  %v570_v26 = vpop.f32.mrf.mxu1 }
 0x106   : > { %v752_v27 = vadd.f32 %v720_v18, %v688_v11  ;;  %v880_v28 = vsub.f32 %v816_v12, %v848_v19  ;;  %v768_v29 = vadd.f32 %v736_v20, %v704_v13  ;;  %v689_v31 = vmul.f32 %v631_v17, %v490_v25  ;;  %v637_v13 = vld [vmem:[%s1252_s29 + $0x90] sm:$0xff]  ;;  %v638_v18 = vld [vmem:[%s1252_s29 + $0x98] sm:$0xff] }
 0x107   : > { %v896_v30 = vsub.f32 %v832_v14, %v864_v21  ;;  %v817_v32 = vmul.f32 %v632_v22, %v490_v25  ;;  %v705_v33 = vmul.f32 %v663_v23, %v570_v26  ;;  %v833_v34 = vmul.f32 %v664_v24, %v570_v26  ;;  %v492_v35 = vpop.f32.mrf.mxu0  ;;  %v572_v36 = vpop.f32.mrf.mxu1  ;;  %v669_v19 = vld [vmem:[%s1252_s29 + $0x190] sm:$0xff]  ;;  %v670_v20 = vld [vmem:[%s1252_s29 + $0x198] sm:$0xff] }
 0x108   : > { %784 = vst [vmem:[%s1265_s4 + $0x50] sm:$0xff] %v752_v27  ;;  %912 = vst [vmem:[%s1265_s4 + $0x58] sm:$0xff] %v880_v28  ;;  %v721_v38 = vmul.f32 %v632_v22, %v492_v35  ;;  %v849_v39 = vmul.f32 %v631_v17, %v492_v35  ;;  %v737_v40 = vmul.f32 %v664_v24, %v572_v36 }
 0x109   : > { %800 = vst [vmem:[%s1265_s4 + $0x150] sm:$0xff] %v768_v29  ;;  %928 = vst [vmem:[%s1265_s4 + $0x158] sm:$0xff] %v896_v30  ;;  %v865_v41 = vmul.f32 %v663_v23, %v572_v36  ;;  %v494_v45 = vpop.f32.mrf.mxu0  ;;  %v574_v46 = vpop.f32.mrf.mxu1 }
 0x10a   : > { %v753_v47 = vadd.f32 %v721_v38, %v689_v31  ;;  %v881_v48 = vsub.f32 %v817_v32, %v849_v39  ;;  %v769_v49 = vadd.f32 %v737_v40, %v705_v33  ;;  %v690_v51 = vmul.f32 %v633_v37, %v494_v45  ;;  %v639_v33 = vld [vmem:[%s1252_s29 + $0xa0] sm:$0xff]  ;;  %v640_v38 = vld [vmem:[%s1252_s29 + $0xa8] sm:$0xff] }
 0x10b   : > { %v897_v50 = vsub.f32 %v833_v34, %v865_v41  ;;  %v818_v52 = vmul.f32 %v634_v42, %v494_v45  ;;  %v706_v53 = vmul.f32 %v665_v43, %v574_v46  ;;  %v834_v54 = vmul.f32 %v666_v44, %v574_v46  ;;  %v496_v55 = vpop.f32.mrf.mxu0  ;;  %v576_v56 = vpop.f32.mrf.mxu1  ;;  %v671_v39 = vld [vmem:[%s1252_s29 + $0x1a0] sm:$0xff]  ;;  %v672_v40 = vld [vmem:[%s1252_s29 + $0x1a8] sm:$0xff] }
 0x10c   : > { %785 = vst [vmem:[%s1265_s4 + $0x60] sm:$0xff] %v753_v47  ;;  %913 = vst [vmem:[%s1265_s4 + $0x68] sm:$0xff] %v881_v48  ;;  %v722_v58 = vmul.f32 %v634_v42, %v496_v55  ;;  %v850_v59 = vmul.f32 %v633_v37, %v496_v55  ;;  %v738_v60 = vmul.f32 %v666_v44, %v576_v56 }
 0x10d   : > { %801 = vst [vmem:[%s1265_s4 + $0x160] sm:$0xff] %v769_v49  ;;  %929 = vst [vmem:[%s1265_s4 + $0x168] sm:$0xff] %v897_v50  ;;  %v866_v61 = vmul.f32 %v665_v43, %v576_v56  ;;  %v500_v1 = vpop.f32.mrf.mxu0  ;;  %v580_v2 = vpop.f32.mrf.mxu1 }
 0x10e   : > { %v754_v3 = vadd.f32 %v722_v58, %v690_v51  ;;  %v882_v4 = vsub.f32 %v818_v52, %v850_v59  ;;  %v770_v5 = vadd.f32 %v738_v60, %v706_v53  ;;  %v691_v7 = vmul.f32 %v635_v57, %v500_v1  ;;  %v641_v53 = vld [vmem:[%s1252_s29 + $0xb0] sm:$0xff]  ;;  %v642_v58 = vld [vmem:[%s1252_s29 + $0xb8] sm:$0xff] }
 0x10f   : > { %v898_v6 = vsub.f32 %v834_v54, %v866_v61  ;;  %v819_v8 = vmul.f32 %v636_v62, %v500_v1  ;;  %v707_v9 = vmul.f32 %v667_v63, %v580_v2  ;;  %v835_v10 = vmul.f32 %v668_v0, %v580_v2  ;;  %v502_v11 = vpop.f32.mrf.mxu0  ;;  %v582_v12 = vpop.f32.mrf.mxu1  ;;  %v673_v59 = vld [vmem:[%s1252_s29 + $0x1b0] sm:$0xff]  ;;  %v674_v60 = vld [vmem:[%s1252_s29 + $0x1b8] sm:$0xff] }
 0x110   : > { %786 = vst [vmem:[%s1265_s4 + $0x70] sm:$0xff] %v754_v3  ;;  %914 = vst [vmem:[%s1265_s4 + $0x78] sm:$0xff] %v882_v4  ;;  %v723_v14 = vmul.f32 %v636_v62, %v502_v11  ;;  %v851_v15 = vmul.f32 %v635_v57, %v502_v11  ;;  %v739_v16 = vmul.f32 %v668_v0, %v582_v12 }
 0x111   : > { %802 = vst [vmem:[%s1265_s4 + $0x170] sm:$0xff] %v770_v5  ;;  %930 = vst [vmem:[%s1265_s4 + $0x178] sm:$0xff] %v898_v6  ;;  %v867_v17 = vmul.f32 %v667_v63, %v582_v12  ;;  %v504_v21 = vpop.f32.mrf.mxu0  ;;  %v584_v22 = vpop.f32.mrf.mxu1 }
 0x112   : > { %v755_v23 = vadd.f32 %v723_v14, %v691_v7  ;;  %v883_v24 = vsub.f32 %v819_v8, %v851_v15  ;;  %v771_v25 = vadd.f32 %v739_v16, %v707_v9  ;;  %v692_v27 = vmul.f32 %v637_v13, %v504_v21  ;;  %v643_v9 = vld [vmem:[%s1252_s29 + $0xc0] sm:$0xff]  ;;  %v644_v14 = vld [vmem:[%s1252_s29 + $0xc8] sm:$0xff] }
 0x113   : > { %v899_v26 = vsub.f32 %v835_v10, %v867_v17  ;;  %v820_v28 = vmul.f32 %v638_v18, %v504_v21  ;;  %v708_v29 = vmul.f32 %v669_v19, %v584_v22  ;;  %v836_v30 = vmul.f32 %v670_v20, %v584_v22  ;;  %v506_v31 = vpop.f32.mrf.mxu0  ;;  %v586_v32 = vpop.f32.mrf.mxu1  ;;  %v675_v15 = vld [vmem:[%s1252_s29 + $0x1c0] sm:$0xff]  ;;  %v676_v16 = vld [vmem:[%s1252_s29 + $0x1c8] sm:$0xff] }
 0x114   : > { %787 = vst [vmem:[%s1265_s4 + $0x80] sm:$0xff] %v755_v23  ;;  %915 = vst [vmem:[%s1265_s4 + $0x88] sm:$0xff] %v883_v24  ;;  %v724_v34 = vmul.f32 %v638_v18, %v506_v31  ;;  %v852_v35 = vmul.f32 %v637_v13, %v506_v31  ;;  %v740_v36 = vmul.f32 %v670_v20, %v586_v32 }
 0x115   : > { %803 = vst [vmem:[%s1265_s4 + $0x180] sm:$0xff] %v771_v25  ;;  %931 = vst [vmem:[%s1265_s4 + $0x188] sm:$0xff] %v899_v26  ;;  %v868_v37 = vmul.f32 %v669_v19, %v586_v32  ;;  %v510_v41 = vpop.f32.mrf.mxu0  ;;  %v590_v42 = vpop.f32.mrf.mxu1 }
 0x116   : > { %v756_v43 = vadd.f32 %v724_v34, %v692_v27  ;;  %v884_v44 = vsub.f32 %v820_v28, %v852_v35  ;;  %v772_v45 = vadd.f32 %v740_v36, %v708_v29  ;;  %v693_v47 = vmul.f32 %v639_v33, %v510_v41  ;;  %v645_v29 = vld [vmem:[%s1252_s29 + $0xd0] sm:$0xff]  ;;  %v646_v34 = vld [vmem:[%s1252_s29 + $0xd8] sm:$0xff] }
 0x117   : > { %v900_v46 = vsub.f32 %v836_v30, %v868_v37  ;;  %v821_v48 = vmul.f32 %v640_v38, %v510_v41  ;;  %v709_v49 = vmul.f32 %v671_v39, %v590_v42  ;;  %v837_v50 = vmul.f32 %v672_v40, %v590_v42  ;;  %v512_v51 = vpop.f32.mrf.mxu0  ;;  %v592_v52 = vpop.f32.mrf.mxu1  ;;  %v677_v35 = vld [vmem:[%s1252_s29 + $0x1d0] sm:$0xff]  ;;  %v678_v36 = vld [vmem:[%s1252_s29 + $0x1d8] sm:$0xff] }
 0x118   : > { %788 = vst [vmem:[%s1265_s4 + $0x90] sm:$0xff] %v756_v43  ;;  %916 = vst [vmem:[%s1265_s4 + $0x98] sm:$0xff] %v884_v44  ;;  %v725_v54 = vmul.f32 %v640_v38, %v512_v51  ;;  %v853_v55 = vmul.f32 %v639_v33, %v512_v51  ;;  %v741_v56 = vmul.f32 %v672_v40, %v592_v52 }
 0x119   : > { %804 = vst [vmem:[%s1265_s4 + $0x190] sm:$0xff] %v772_v45  ;;  %932 = vst [vmem:[%s1265_s4 + $0x198] sm:$0xff] %v900_v46  ;;  %v869_v57 = vmul.f32 %v671_v39, %v592_v52  ;;  %v514_v61 = vpop.f32.mrf.mxu0  ;;  %v594_v62 = vpop.f32.mrf.mxu1 }
 0x11a   : > { %v757_v63 = vadd.f32 %v725_v54, %v693_v47  ;;  %v885_v0 = vsub.f32 %v821_v48, %v853_v55  ;;  %v773_v1 = vadd.f32 %v741_v56, %v709_v49  ;;  %v694_v3 = vmul.f32 %v641_v53, %v514_v61  ;;  %v647_v49 = vld [vmem:[%s1252_s29 + $0xe0] sm:$0xff]  ;;  %v648_v54 = vld [vmem:[%s1252_s29 + $0xe8] sm:$0xff] }
 0x11b   : > { %v901_v2 = vsub.f32 %v837_v50, %v869_v57  ;;  %v822_v4 = vmul.f32 %v642_v58, %v514_v61  ;;  %v710_v5 = vmul.f32 %v673_v59, %v594_v62  ;;  %v838_v6 = vmul.f32 %v674_v60, %v594_v62  ;;  %v516_v7 = vpop.f32.mrf.mxu0  ;;  %v596_v8 = vpop.f32.mrf.mxu1  ;;  %v679_v55 = vld [vmem:[%s1252_s29 + $0x1e0] sm:$0xff]  ;;  %v680_v56 = vld [vmem:[%s1252_s29 + $0x1e8] sm:$0xff] }
 0x11c   : > { %789 = vst [vmem:[%s1265_s4 + $0xa0] sm:$0xff] %v757_v63  ;;  %917 = vst [vmem:[%s1265_s4 + $0xa8] sm:$0xff] %v885_v0  ;;  %v726_v10 = vmul.f32 %v642_v58, %v516_v7  ;;  %v854_v11 = vmul.f32 %v641_v53, %v516_v7  ;;  %v742_v12 = vmul.f32 %v674_v60, %v596_v8 }
 0x11d   : > { %805 = vst [vmem:[%s1265_s4 + $0x1a0] sm:$0xff] %v773_v1  ;;  %933 = vst [vmem:[%s1265_s4 + $0x1a8] sm:$0xff] %v901_v2  ;;  %v870_v13 = vmul.f32 %v673_v59, %v596_v8  ;;  %v520_v17 = vpop.f32.mrf.mxu0  ;;  %v600_v18 = vpop.f32.mrf.mxu1 }
 0x11e   : > { %v758_v19 = vadd.f32 %v726_v10, %v694_v3  ;;  %v886_v20 = vsub.f32 %v822_v4, %v854_v11  ;;  %v774_v21 = vadd.f32 %v742_v12, %v710_v5  ;;  %v695_v23 = vmul.f32 %v643_v9, %v520_v17  ;;  %v649_v5 = vld [vmem:[%s1252_s29 + $0xf0] sm:$0xff]  ;;  %v650_v10 = vld [vmem:[%s1252_s29 + $0xf8] sm:$0xff] }
 0x11f   : > { %v902_v22 = vsub.f32 %v838_v6, %v870_v13  ;;  %v823_v24 = vmul.f32 %v644_v14, %v520_v17  ;;  %v711_v25 = vmul.f32 %v675_v15, %v600_v18  ;;  %v839_v26 = vmul.f32 %v676_v16, %v600_v18  ;;  %v522_v27 = vpop.f32.mrf.mxu0  ;;  %v602_v28 = vpop.f32.mrf.mxu1  ;;  %v681_v11 = vld [vmem:[%s1252_s29 + $0x1f0] sm:$0xff]  ;;  %v682_v12 = vld [vmem:[%s1252_s29 + $0x1f8] sm:$0xff] }
 0x120   : > { %790 = vst [vmem:[%s1265_s4 + $0xb0] sm:$0xff] %v758_v19  ;;  %918 = vst [vmem:[%s1265_s4 + $0xb8] sm:$0xff] %v886_v20  ;;  %v727_v30 = vmul.f32 %v644_v14, %v522_v27  ;;  %v855_v31 = vmul.f32 %v643_v9, %v522_v27  ;;  %v743_v32 = vmul.f32 %v676_v16, %v602_v28 }
 0x121   : > { %806 = vst [vmem:[%s1265_s4 + $0x1b0] sm:$0xff] %v774_v21  ;;  %934 = vst [vmem:[%s1265_s4 + $0x1b8] sm:$0xff] %v902_v22  ;;  %v871_v33 = vmul.f32 %v675_v15, %v602_v28  ;;  %v524_v37 = vpop.f32.mrf.mxu0  ;;  %v604_v38 = vpop.f32.mrf.mxu1 }
 0x122   : > { %v759_v39 = vadd.f32 %v727_v30, %v695_v23  ;;  %v887_v40 = vsub.f32 %v823_v24, %v855_v31  ;;  %v775_v41 = vadd.f32 %v743_v32, %v711_v25  ;;  %v696_v43 = vmul.f32 %v645_v29, %v524_v37 }
 0x123   : > { %v903_v42 = vsub.f32 %v839_v26, %v871_v33  ;;  %v824_v44 = vmul.f32 %v646_v34, %v524_v37  ;;  %v712_v45 = vmul.f32 %v677_v35, %v604_v38  ;;  %v840_v46 = vmul.f32 %v678_v36, %v604_v38  ;;  %v526_v47 = vpop.f32.mrf.mxu0  ;;  %v606_v48 = vpop.f32.mrf.mxu1 }
 0x124   : > { %791 = vst [vmem:[%s1265_s4 + $0xc0] sm:$0xff] %v759_v39  ;;  %919 = vst [vmem:[%s1265_s4 + $0xc8] sm:$0xff] %v887_v40  ;;  %v728_v50 = vmul.f32 %v646_v34, %v526_v47  ;;  %v856_v51 = vmul.f32 %v645_v29, %v526_v47  ;;  %v744_v52 = vmul.f32 %v678_v36, %v606_v48 }
 0x125   : > { %807 = vst [vmem:[%s1265_s4 + $0x1c0] sm:$0xff] %v775_v41  ;;  %935 = vst [vmem:[%s1265_s4 + $0x1c8] sm:$0xff] %v903_v42  ;;  %v872_v53 = vmul.f32 %v677_v35, %v606_v48  ;;  %v530_v57 = vpop.f32.mrf.mxu0  ;;  %v610_v58 = vpop.f32.mrf.mxu1 }
 0x126   : > { %v760_v59 = vadd.f32 %v728_v50, %v696_v43  ;;  %v888_v60 = vsub.f32 %v824_v44, %v856_v51  ;;  %v776_v61 = vadd.f32 %v744_v52, %v712_v45  ;;  %v697_v63 = vmul.f32 %v647_v49, %v530_v57 }
 0x127   : > { %v904_v62 = vsub.f32 %v840_v46, %v872_v53  ;;  %v825_v0 = vmul.f32 %v648_v54, %v530_v57  ;;  %v713_v1 = vmul.f32 %v679_v55, %v610_v58  ;;  %v841_v2 = vmul.f32 %v680_v56, %v610_v58  ;;  %v532_v3 = vpop.f32.mrf.mxu0  ;;  %v612_v4 = vpop.f32.mrf.mxu1 }
 0x128   : > { %792 = vst [vmem:[%s1265_s4 + $0xd0] sm:$0xff] %v760_v59  ;;  %920 = vst [vmem:[%s1265_s4 + $0xd8] sm:$0xff] %v888_v60  ;;  %v729_v6 = vmul.f32 %v648_v54, %v532_v3  ;;  %v857_v7 = vmul.f32 %v647_v49, %v532_v3  ;;  %v745_v8 = vmul.f32 %v680_v56, %v612_v4 }
 0x129   : > { %808 = vst [vmem:[%s1265_s4 + $0x1d0] sm:$0xff] %v776_v61  ;;  %936 = vst [vmem:[%s1265_s4 + $0x1d8] sm:$0xff] %v904_v62  ;;  %v873_v9 = vmul.f32 %v679_v55, %v612_v4  ;;  %v534_v13 = vpop.f32.mrf.mxu0  ;;  %v614_v14 = vpop.f32.mrf.mxu1 }
 0x12a   : > { %v761_v15 = vadd.f32 %v729_v6, %v697_v63  ;;  %v889_v16 = vsub.f32 %v825_v0, %v857_v7  ;;  %v777_v17 = vadd.f32 %v745_v8, %v713_v1  ;;  %v698_v20 = vmul.f32 %v649_v5, %v534_v13 }
 0x12b   : > { %v905_v18 = vsub.f32 %v841_v2, %v873_v9  ;;  %v536_v19 = vpop.f32.mrf.mxu0  ;;  %v826_v21 = vmul.f32 %v650_v10, %v534_v13  ;;  %v616_v22 = vpop.f32.mrf.mxu1  ;;  %v714_v23 = vmul.f32 %v681_v11, %v614_v14  ;;  %v842_v24 = vmul.f32 %v682_v12, %v614_v14 }
 0x12c   : > { %793 = vst [vmem:[%s1265_s4 + $0xe0] sm:$0xff] %v761_v15  ;;  %921 = vst [vmem:[%s1265_s4 + $0xe8] sm:$0xff] %v889_v16  ;;  %v730_v25 = vmul.f32 %v650_v10, %v536_v19  ;;  %v858_v26 = vmul.f32 %v649_v5, %v536_v19  ;;  %v746_v27 = vmul.f32 %v682_v12, %v616_v22 }
 0x12d   : > { %809 = vst [vmem:[%s1265_s4 + $0x1e0] sm:$0xff] %v777_v17  ;;  %937 = vst [vmem:[%s1265_s4 + $0x1e8] sm:$0xff] %v905_v18  ;;  %v874_v28 = vmul.f32 %v681_v11, %v616_v22 }
 0x12e   : > { %v762_v29 = vadd.f32 %v730_v25, %v698_v20  ;;  %v890_v30 = vsub.f32 %v826_v21, %v858_v26  ;;  %v778_v31 = vadd.f32 %v746_v27, %v714_v23 }
 0x12f   : > { %v906_v32 = vsub.f32 %v842_v24, %v874_v28 }
 0x130   : > { %794 = vst [vmem:[%s1265_s4 + $0xf0] sm:$0xff] %v762_v29  ;;  %922 = vst [vmem:[%s1265_s4 + $0xf8] sm:$0xff] %v890_v30 }
 0x131   : > { %810 = vst [vmem:[%s1265_s4 + $0x1f0] sm:$0xff] %v778_v31  ;;  %938 = vst [vmem:[%s1265_s4 + $0x1f8] sm:$0xff] %v906_v32 }
 0x132 PF: > { %s13_s12 = sadd.s32 1, %s1129_s12  }
 0x133   : > { %p10_p4 = scmp.ge.s32.totalorder %s13_s12, 4  }
 0x135   :  { %12 = sbr.rel (!%p10_p4) target bundleno = 1 (0x1), region = 65 }

</bundles_post_ra>
